<compile_context>
chip_gen: v7x
topology: tpu7x:2x2x1
jax: 0.10.0
libtpu: 0.0.40
codegen_flags: <defaults>
</compile_context>

<pallas_src>
import jax
import jax.numpy as jnp
from jax.experimental import pallas as pl
from jax.experimental.pallas import tpu as pltpu

EPS = 1e-8


# ----------------------------------------------------------------------------
# VMEM / tiling configuration
# ----------------------------------------------------------------------------
def _vmem_config():
    """Return (vmem_limit_bytes, f32 per-block budget), generation aware."""
    try:
        cap = int(pltpu.get_tpu_info().vmem_capacity_bytes)
    except Exception:
        cap = 0
    if cap > (96 << 20):           # v5e / v6e class: 128 MiB VMEM per core
        return 100 << 20, 12 << 20
    # v7x class (64 MiB per TensorCore) or unknown -> conservative config
    return 48 << 20, 6 << 20


def _round_up(n, m):
    return ((n + m - 1) // m) * m


def _pick_hw_tile(hw_padded, C, budget_bytes, max_lanes=64 * 128):
    """Largest multiple of 128 dividing hw_padded with C*t*4 <= budget.

    `max_lanes` bounds the static unroll of the lane-partial accumulation
    (t/128 chunks) in the two-phase kernel.
    """
    cap = (budget_bytes // (C * 4 * 128)) * 128
    cap = max(128, min(cap, max_lanes, hw_padded))
    t = cap
    while t > 128 and hw_padded % t != 0:
        t -= 128
    return t


# ----------------------------------------------------------------------------
# Fused single-phase kernel: whole (C_b, HW) slab resident, x read once.
# ----------------------------------------------------------------------------
def _make_fused_kernel(binary_mask):
    def kernel(x_ref, m_ref, sc_ref, bi_ref, o_ref):
        x = x_ref[0].astype(jnp.float32)          # (Cb, HW)
        m = m_ref[0].astype(jnp.float32)          # (1, HW)
        t = x * m
        s_t = jnp.sum(t, axis=1, keepdims=True)   # sum(x*m)      (Cb,1)
        s_tt = jnp.sum(t * t, axis=1, keepdims=True)
        s_m = jnp.sum(m, axis=1, keepdims=True)   # sum(m)        (1,1)
        if binary_mask:
            s_tm, s_mm = s_t, s_m                 # m^2 == m for 0/1 masks
        else:
            s_tm = jnp.sum(t * m, axis=1, keepdims=True)
            s_mm = jnp.sum(m * m, axis=1, keepdims=True)

        inv_sm = 1.0 / s_m
        mean = s_t * inv_sm
        var = (s_tt - 2.0 * mean * s_tm + mean * mean * s_mm) * inv_sm
        var = jnp.maximum(var, 0.0)               # one-pass cancellation guard
        a = sc_ref[0] * jax.lax.rsqrt(EPS + var)  # (Cb,1)
        b = bi_ref[0] - mean * a
        o_ref[0] = ((x * a + b) * m).astype(o_ref.dtype)

    return kernel


# ----------------------------------------------------------------------------
# Two-phase kernel: phase 0 accumulates stats over HW tiles, phase 1 applies.
# ----------------------------------------------------------------------------
def _make_two_phase_kernel(binary_mask, t_hw):
    n_chunks = t_hw // 128                        # static unroll count

    def kernel(x_ref, m_ref, sc_ref, bi_ref, o_ref,
               s_t, s_tt, s_tm, s_m, s_mm, a_sc, b_sc):
        p = pl.program_id(1)                      # 0 = stats, 1 = apply
        h = pl.program_id(2)                      # HW-tile index

        @pl.when(jnp.logical_and(p == 0, h == 0))
        def _init():
            s_t[...] = jnp.zeros_like(s_t)
            s_tt[...] = jnp.zeros_like(s_tt)
            s_m[...] = jnp.zeros_like(s_m)
            if not binary_mask:
                s_tm[...] = jnp.zeros_like(s_tm)
                s_mm[...] = jnp.zeros_like(s_mm)

        @pl.when(p == 0)
        def _accumulate():
            # Lane-aligned 128-wide chunks: pure VALU adds into (C,128)
            # partials, no per-tile cross-lane (XLU) reduce, no 1-lane RMW.
            xn = x_ref[0]                         # (C, t_hw) native dtype
            mn = m_ref[0]                         # (1, t_hw)
            p_t = p_tt = p_tm = p_m = p_mm = None
            for i in range(n_chunks):
                sl = slice(i * 128, (i + 1) * 128)
                xc = xn[:, sl].astype(jnp.float32)    # cast inside the branch
                mc = mn[:, sl].astype(jnp.float32)
                tc = xc * mc
                p_t = tc if p_t is None else p_t + tc
                p_tt = tc * tc if p_tt is None else p_tt + tc * tc
                p_m = mc if p_m is None else p_m + mc
                if not binary_mask:
                    p_tm = tc * mc if p_tm is None else p_tm + tc * mc
                    p_mm = mc * mc if p_mm is None else p_mm + mc * mc
            s_t[...] += p_t
            s_tt[...] += p_tt
            s_m[...] += p_m
            if not binary_mask:
                s_tm[...] += p_tm
                s_mm[...] += p_mm

        @pl.when(jnp.logical_and(p == 1, h == 0))
        def _finalize():
            # Single cross-lane reduce of the lane-wide partials, once/batch.
            st = jnp.sum(s_t[...], axis=1, keepdims=True)      # (C,1)
            stt = jnp.sum(s_tt[...], axis=1, keepdims=True)
            sm = jnp.sum(s_m[...], axis=1, keepdims=True)      # (1,1)
            if binary_mask:
                stm, smm = st, sm
            else:
                stm = jnp.sum(s_tm[...], axis=1, keepdims=True)
                smm = jnp.sum(s_mm[...], axis=1, keepdims=True)
            inv_sm = 1.0 / sm
            mean = st * inv_sm
            var = (stt - 2.0 * mean * stm + mean * mean * smm) * inv_sm
            var = jnp.maximum(var, 0.0)
            a = sc_ref[0] * jax.lax.rsqrt(EPS + var)
            a_sc[...] = a
            b_sc[...] = bi_ref[0] - mean * a

        @pl.when(p == 1)
        def _apply():
            x = x_ref[0].astype(jnp.float32)      # cast inside the branch
            m = m_ref[0].astype(jnp.float32)
            o_ref[0] = ((x * a_sc[...] + b_sc[...]) * m).astype(o_ref.dtype)

    return kernel


# ----------------------------------------------------------------------------
# Wrapper
# ----------------------------------------------------------------------------
def mask_adain(x, mask, w, ws, bs, wb, bb, w1=None, ratio=(0.0, 1.0),
               interp_mode="inter", hw_tile=None, channel_blocks=None,
               assume_binary_mask=False):
    """Pallas MaskAdaIN forward.

    x    : (B, C, H, W)     features
    mask : (B, 1, H, W)     spatial mask (broadcast over channels)
    w    : (B, w_dim, 1, 1) style code (w1 optional, same shape)
    ws/wb: (C, w_dim)       1x1 conv weights (scale / bias transform)
    bs/bb: (C,)             conv biases
    """
    B, C, H, W = x.shape
    HW = H * W
    w_dim = ws.shape[1]
    assert x.shape[0] == mask.shape[0]

    # --- 1x1 convs on a 1x1-spatial style code == one batched matmul (XLA) ---
    wsb = jnp.concatenate([ws, wb], axis=0).astype(jnp.float32)      # (2C, w_dim)
    bsb = jnp.concatenate([bs, bb], axis=0).astype(jnp.float32)      # (2C,)

    def affine(wv):
        out = wv.reshape(B, w_dim).astype(jnp.float32) @ wsb.T + bsb  # (B, 2C)
        return out[:, :C], out[:, C:]

    scale, bias = affine(w)
    if w1 is not None:
        scale1, bias1 = affine(w1)
        r0, r1 = float(ratio[0]), float(ratio[1])
        if interp_mode == "inter":
            scale = (r0 * scale + r1 * scale1) / (r0 + r1)
            bias = (r0 * bias + r1 * bias1) / (r0 + r1)
        elif interp_mode == "extra":
            scale = (r0 * scale - r1 * scale1) / (r0 - r1)
            bias = (r0 * bias - r1 * bias1) / (r0 - r1)
        else:
            raise ValueError(f"Invalid interpolation mode {interp_mode}.")
    scale = scale.reshape(B, C, 1)
    bias = bias.reshape(B, C, 1)

    vmem_limit, block_budget = _vmem_config()

    # --- channel split (helps v7x megacore at small batch / fused fitting) ---
    if hw_tile is not None:
        n_cb = 1
    elif channel_blocks is not None:
        n_cb = int(channel_blocks)
        assert n_cb >= 1 and C % n_cb == 0
        assert n_cb == 1 or (C // n_cb) % 8 == 0, "channel block must be 8-aligned"
    else:
        n_cb = 1
        if C % 16 == 0:
            half_fits = (C // 2) * HW * 4 <= block_budget
            full_fits = C * HW * 4 <= block_budget
            if half_fits and (B <= 2 or not full_fits):
                n_cb = 2
    C_b = C // n_cb

    fused = (hw_tile is None) and (C_b * HW * 4 <= block_budget)

    x3 = x.reshape(B, C, HW)
    m3 = mask.reshape(B, 1, HW)

    if fused:
        # ---------------- single-pass resident-slab kernel ----------------
        out = pl.pallas_call(
            _make_fused_kernel(assume_binary_mask),
            out_shape=jax.ShapeDtypeStruct((B, C, HW), x.dtype),
            grid_spec=pltpu.PrefetchScalarGridSpec(
                num_scalar_prefetch=0,
                grid=(B, n_cb),
                in_specs=[
                    pl.BlockSpec((1, C_b, HW), lambda b, cb: (b, cb, 0)),   # x
                    pl.BlockSpec((1, 1, HW), lambda b, cb: (b, 0, 0)),      # mask
                    pl.BlockSpec((1, C_b, 1), lambda b, cb: (b, cb, 0)),    # scale
                    pl.BlockSpec((1, C_b, 1), lambda b, cb: (b, cb, 0)),    # bias
                ],
                out_specs=pl.BlockSpec((1, C_b, HW), lambda b, cb: (b, cb, 0)),
            ),
            compiler_params=pltpu.CompilerParams(
                dimension_semantics=("parallel", "parallel"),
                vmem_limit_bytes=vmem_limit,
            ),
        )(x3, m3, scale, bias)
        return out.reshape(B, C, H, W)

    # ---------------- two-phase tiled kernel (large feature maps) ----------------
    if hw_tile is not None:
        t_hw = int(hw_tile)
        assert t_hw % 128 == 0, "hw_tile must be a multiple of 128"
        HWp = HW if HW % t_hw == 0 else _round_up(HW, t_hw)
    else:
        HWp = HW if HW % 128 == 0 else _round_up(HW, 128)
        t_hw = _pick_hw_tile(HWp, C, block_budget)
    assert HWp % t_hw == 0
    n_hw = HWp // t_hw

    if HWp != HW:
        # Zero padding: padded mask is 0, so it contributes nothing to the
        # masked statistics and the padded outputs are exactly 0 (sliced off).
        pad = HWp - HW
        x3 = jnp.pad(x3, ((0, 0), (0, 0), (0, pad)))
        m3 = jnp.pad(m3, ((0, 0), (0, 0), (0, pad)))

    out = pl.pallas_call(
        _make_two_phase_kernel(assume_binary_mask, t_hw),
        out_shape=jax.ShapeDtypeStruct((B, C, HWp), x.dtype),
        grid_spec=pltpu.PrefetchScalarGridSpec(
            num_scalar_prefetch=0,
            grid=(B, 2, n_hw),                     # (batch, phase, HW tile)
            in_specs=[
                pl.BlockSpec((1, C, t_hw), lambda b, p, h: (b, 0, h)),   # x
                pl.BlockSpec((1, 1, t_hw), lambda b, p, h: (b, 0, h)),   # mask
                pl.BlockSpec((1, C, 1), lambda b, p, h: (b, 0, 0)),      # scale
                pl.BlockSpec((1, C, 1), lambda b, p, h: (b, 0, 0)),      # bias
            ],
            # During the stats phase (p==0) the output index is pinned to tile
            # 0, so no partially-written blocks are flushed; each output tile
            # is written exactly once, during the apply phase (p==1).
            out_specs=pl.BlockSpec((1, C, t_hw), lambda b, p, h: (b, 0, h * p)),
            scratch_shapes=[
                pltpu.VMEM((C, 128), jnp.float32),   # lane partials: sum(x*m)
                pltpu.VMEM((C, 128), jnp.float32),   # sum((x*m)^2)
                pltpu.VMEM((C, 128), jnp.float32),   # sum(x*m^2)
                pltpu.VMEM((1, 128), jnp.float32),   # sum(m)
                pltpu.VMEM((1, 128), jnp.float32),   # sum(m^2)
                pltpu.VMEM((C, 1), jnp.float32),     # A = scale*rsqrt(eps+var)
                pltpu.VMEM((C, 1), jnp.float32),     # B = bias - mean*A
            ],
        ),
        compiler_params=pltpu.CompilerParams(
            dimension_semantics=("parallel", "arbitrary", "arbitrary"),
            vmem_limit_bytes=vmem_limit,
        ),
    )(x3, m3, scale, bias)

    if HWp != HW:
        out = out[:, :, :HW]
    return out.reshape(B, C, H, W)


# ----------------------------------------------------------------------------
# Pure-JAX reference mirroring the PyTorch forward (w1=None path), in f32.
# ----------------------------------------------------------------------------
def _reference(x, mask, w, ws, bs, wb, bb):
    def mean2d(t):
        return jnp.mean(jnp.mean(t, axis=3, keepdims=True), axis=2, keepdims=True)

    mean = mean2d(x * mask) / mean2d(mask)
    var = mean2d(((x - mean) * mask) ** 2) / mean2d(mask)
    xn = (x - mean) / jnp.sqrt(EPS + var)
    wv = w[:, :, 0, 0]                                   # (B, w_dim)
    scale = (wv @ ws.T + bs)[:, :, None, None]
    bias = (wv @ wb.T + bb)[:, :, None, None]
    return (scale * xn + bias) * mask


if __name__ == "__main__":
    key = jax.random.PRNGKey(0)
    kx, km, kw, kws, kwb = jax.random.split(key, 5)

    B, C, H, W = 2, 4, 16, 16        # dim = 4
    w_dim = 8

    x = jax.random.normal(kx, (B, C, H, W), dtype=jnp.float32)
    mask = (jax.random.uniform(km, (B, 1, H, W)) > 0.3).astype(jnp.float32)
    w = jax.random.normal(kw, (B, w_dim, 1, 1), dtype=jnp.float32)

    # Synthetic parameters matching the module's shapes/init style.
    ws = 0.1 * jax.random.normal(kws, (C, w_dim), dtype=jnp.float32)
    bs = jnp.zeros((C,), dtype=jnp.float32)
    wb = 0.02 * jax.random.normal(kwb, (C, w_dim), dtype=jnp.float32)
    bb = jnp.zeros((C,), dtype=jnp.float32)

    ref = _reference(x, mask, w, ws, bs, wb, bb)

    # 1) fused single-pass path (slab fits VMEM, x read from HBM once)
    out = jax.block_until_ready(mask_adain(x, mask, w, ws, bs, wb, bb))
    assert out.shape == (B, C, H, W)
    assert jnp.allclose(out, ref, rtol=1e-3, atol=1e-3), "mismatch (fused)"

    # 2) forced two-phase path with multi-tile stats accumulation
    out_t = jax.block_until_ready(
        mask_adain(x, mask, w, ws, bs, wb, bb, hw_tile=128))
    assert jnp.allclose(out_t, ref, rtol=1e-3, atol=1e-3), "mismatch (tiled 128)"

    # 3) two-phase, single tile, multi-chunk lane partials (t_hw=256 -> 2 chunks)
    out_t2 = jax.block_until_ready(
        mask_adain(x, mask, w, ws, bs, wb, bb, hw_tile=256))
    assert jnp.allclose(out_t2, ref, rtol=1e-3, atol=1e-3), "mismatch (tiled 256)"

    # 4) binary-mask fast path
    out_b = jax.block_until_ready(
        mask_adain(x, mask, w, ws, bs, wb, bb, assume_binary_mask=True))
    assert jnp.allclose(out_b, ref, rtol=1e-3, atol=1e-3), "mismatch (binary)"

    # 5) native-dtype (bf16) I/O path — no wrapper up-cast, bf16 in HBM
    out_bf = jax.block_until_ready(
        mask_adain(x.astype(jnp.bfloat16), mask.astype(jnp.bfloat16),
                   w, ws, bs, wb, bb))
    assert out_bf.dtype == jnp.bfloat16
    assert jnp.allclose(out_bf.astype(jnp.float32), ref, rtol=5e-2, atol=5e-2), \
        "mismatch (bf16)"

    # 6) non-128-aligned spatial size (HW=100) on the fused path (full-dim block)
    x10 = jax.random.normal(kx, (B, C, 10, 10), dtype=jnp.float32)
    m10 = (jax.random.uniform(km, (B, 1, 10, 10)) > 0.3).astype(jnp.float32)
    ref10 = _reference(x10, m10, w, ws, bs, wb, bb)
    out10 = jax.block_until_ready(mask_adain(x10, m10, w, ws, bs, wb, bb))
    assert jnp.allclose(out10, ref10, rtol=1e-3, atol=1e-3), "mismatch (HW=100)"

    # 7) non-128-aligned spatial size on the padded two-phase path
    out10_t = jax.block_until_ready(
        mask_adain(x10, m10, w, ws, bs, wb, bb, hw_tile=128))
    assert jnp.allclose(out10_t, ref10, rtol=1e-3, atol=1e-3), \
        "mismatch (HW=100, padded tiled)"

    # 8) channel-split fused path (B=1, C=16 -> two channel blocks, "parallel")
    k2 = jax.random.PRNGKey(1)
    kx2, km2, kw2, kws2, kwb2 = jax.random.split(k2, 5)
    B2, C2 = 1, 16
    x2 = jax.random.normal(kx2, (B2, C2, 16, 16), dtype=jnp.float32)
    m2 = (jax.random.uniform(km2, (B2, 1, 16, 16)) > 0.3).astype(jnp.float32)
    w2 = jax.random.normal(kw2, (B2, w_dim, 1, 1), dtype=jnp.float32)
    ws2 = 0.1 * jax.random.normal(kws2, (C2, w_dim), dtype=jnp.float32)
    bs2 = jnp.zeros((C2,), dtype=jnp.float32)
    wb2 = 0.02 * jax.random.normal(kwb2, (C2, w_dim), dtype=jnp.float32)
    bb2 = jnp.zeros((C2,), dtype=jnp.float32)
    ref2 = _reference(x2, m2, w2, ws2, bs2, wb2, bb2)
    out2 = jax.block_until_ready(mask_adain(x2, m2, w2, ws2, bs2, wb2, bb2))
    assert jnp.allclose(out2, ref2, rtol=1e-3, atol=1e-3), "mismatch (chan split)"

    print("KERNEL_OK")
</pallas_src>

<mosaic_0001>
module attributes {stable_mosaic.version = 11 : i64} {
  func.func @kernel(%arg0: i32, %arg1: i32, %arg2: memref<1x4x256xf32, #tpu.memory_space<vmem>>, %arg3: memref<1x1x256xf32, #tpu.memory_space<vmem>>, %arg4: memref<1x4x1xf32, #tpu.memory_space<vmem>>, %arg5: memref<1x4x1xf32, #tpu.memory_space<vmem>>, %arg6: memref<1x4x256xf32, #tpu.memory_space<vmem>>) attributes {dimension_semantics = [#tpu.dimension_semantics<parallel>, #tpu.dimension_semantics<parallel>], iteration_bounds = array<i64: 2, 1>, scalar_prefetch = 0 : i64, scratch_operands = 0 : i64, tpu.core_type = #tpu.core_type<tc>, window_params = [{transform_indices = @transform_0, window_bounds = array<i64: 1, 4, 256>}, {transform_indices = @transform_1, window_bounds = array<i64: 1, 1, 256>}, {transform_indices = @transform_2, window_bounds = array<i64: 1, 4, 1>}, {transform_indices = @transform_3, window_bounds = array<i64: 1, 4, 1>}, {transform_indices = @transform_4, window_bounds = array<i64: 1, 4, 256>}]} {
    %c0 = arith.constant 0 : index
    %c0_0 = arith.constant 0 : index
    %c0_1 = arith.constant 0 : index
    %0 = vector.load %arg2[%c0, %c0_0, %c0_1] : memref<1x4x256xf32, #tpu.memory_space<vmem>>, vector<1x4x256xf32>
    %1 = vector.shape_cast %0 : vector<1x4x256xf32> to vector<4x256xf32>
    %c0_2 = arith.constant 0 : index
    %c0_3 = arith.constant 0 : index
    %c0_4 = arith.constant 0 : index
    %2 = vector.load %arg3[%c0_2, %c0_3, %c0_4] : memref<1x1x256xf32, #tpu.memory_space<vmem>>, vector<1x1x256xf32>
    %3 = vector.shape_cast %2 : vector<1x1x256xf32> to vector<1x256xf32>
    %4 = vector.broadcast %3 : vector<1x256xf32> to vector<4x256xf32>
    %5 = arith.mulf %1, %4 : vector<4x256xf32>
    %cst = arith.constant dense<0.000000e+00> : vector<4xf32>
    %6 = vector.multi_reduction <add>, %5, %cst [1] : vector<4x256xf32> to vector<4xf32>
    %7 = vector.shape_cast %6 : vector<4xf32> to vector<4x1xf32>
    %8 = arith.mulf %5, %5 : vector<4x256xf32>
    %cst_5 = arith.constant dense<0.000000e+00> : vector<4xf32>
    %9 = vector.multi_reduction <add>, %8, %cst_5 [1] : vector<4x256xf32> to vector<4xf32>
    %10 = vector.shape_cast %9 : vector<4xf32> to vector<4x1xf32>
    %cst_6 = arith.constant dense<0.000000e+00> : vector<1xf32>
    %11 = vector.multi_reduction <add>, %3, %cst_6 [1] : vector<1x256xf32> to vector<1xf32>
    %12 = vector.shape_cast %11 : vector<1xf32> to vector<1x1xf32>
    %13 = vector.broadcast %3 : vector<1x256xf32> to vector<4x256xf32>
    %14 = arith.mulf %5, %13 : vector<4x256xf32>
    %cst_7 = arith.constant dense<0.000000e+00> : vector<4xf32>
    %15 = vector.multi_reduction <add>, %14, %cst_7 [1] : vector<4x256xf32> to vector<4xf32>
    %16 = vector.shape_cast %15 : vector<4xf32> to vector<4x1xf32>
    %17 = arith.mulf %3, %3 : vector<1x256xf32>
    %cst_8 = arith.constant dense<0.000000e+00> : vector<1xf32>
    %18 = vector.multi_reduction <add>, %17, %cst_8 [1] : vector<1x256xf32> to vector<1xf32>
    %19 = vector.shape_cast %18 : vector<1xf32> to vector<1x1xf32>
    %cst_9 = arith.constant 1.000000e+00 : f32
    %20 = vector.broadcast %cst_9 : f32 to vector<1x1xf32>
    %21 = arith.divf %20, %12 : vector<1x1xf32>
    %22 = vector.broadcast %21 : vector<1x1xf32> to vector<4x1xf32>
    %23 = arith.mulf %7, %22 : vector<4x1xf32>
    %cst_10 = arith.constant 2.000000e+00 : f32
    %24 = vector.broadcast %cst_10 : f32 to vector<4x1xf32>
    %25 = arith.mulf %24, %23 : vector<4x1xf32>
    %26 = arith.mulf %25, %16 : vector<4x1xf32>
    %27 = arith.subf %10, %26 : vector<4x1xf32>
    %28 = arith.mulf %23, %23 : vector<4x1xf32>
    %29 = vector.broadcast %19 : vector<1x1xf32> to vector<4x1xf32>
    %30 = arith.mulf %28, %29 : vector<4x1xf32>
    %31 = arith.addf %27, %30 : vector<4x1xf32>
    %32 = vector.broadcast %21 : vector<1x1xf32> to vector<4x1xf32>
    %33 = arith.mulf %31, %32 : vector<4x1xf32>
    %cst_11 = arith.constant 0.000000e+00 : f32
    %34 = vector.broadcast %cst_11 : f32 to vector<4x1xf32>
    %35 = arith.maximumf %33, %34 : vector<4x1xf32>
    %c0_12 = arith.constant 0 : index
    %c0_13 = arith.constant 0 : index
    %c0_14 = arith.constant 0 : index
    %36 = vector.load %arg4[%c0_12, %c0_13, %c0_14] : memref<1x4x1xf32, #tpu.memory_space<vmem>>, vector<1x4x1xf32>
    %37 = vector.shape_cast %36 : vector<1x4x1xf32> to vector<4x1xf32>
    %cst_15 = arith.constant 9.99999993E-9 : f32
    %38 = vector.broadcast %cst_15 : f32 to vector<4x1xf32>
    %39 = arith.addf %38, %35 : vector<4x1xf32>
    %40 = math.rsqrt %39 : vector<4x1xf32>
    %41 = arith.mulf %37, %40 : vector<4x1xf32>
    %c0_16 = arith.constant 0 : index
    %c0_17 = arith.constant 0 : index
    %c0_18 = arith.constant 0 : index
    %42 = vector.load %arg5[%c0_16, %c0_17, %c0_18] : memref<1x4x1xf32, #tpu.memory_space<vmem>>, vector<1x4x1xf32>
    %43 = vector.shape_cast %42 : vector<1x4x1xf32> to vector<4x1xf32>
    %44 = arith.mulf %23, %41 : vector<4x1xf32>
    %45 = arith.subf %43, %44 : vector<4x1xf32>
    %46 = vector.broadcast %41 : vector<4x1xf32> to vector<4x256xf32>
    %47 = arith.mulf %1, %46 : vector<4x256xf32>
    %48 = vector.broadcast %45 : vector<4x1xf32> to vector<4x256xf32>
    %49 = arith.addf %47, %48 : vector<4x256xf32>
    %50 = vector.broadcast %3 : vector<1x256xf32> to vector<4x256xf32>
    %51 = arith.mulf %49, %50 : vector<4x256xf32>
    %c0_19 = arith.constant 0 : index
    %c0_20 = arith.constant 0 : index
    %c0_21 = arith.constant 0 : index
    %52 = vector.load %arg6[%c0_19, %c0_20, %c0_21] : memref<1x4x256xf32, #tpu.memory_space<vmem>>, vector<1x4x256xf32>
    %53 = vector.shape_cast %52 : vector<1x4x256xf32> to vector<4x256xf32>
    %54 = vector.shape_cast %51 : vector<4x256xf32> to vector<1x4x256xf32>
    tpu.vector_store %arg6[%c0_19, %c0_20, %c0_21], %54 {strides = array<i32>} : memref<1x4x256xf32, #tpu.memory_space<vmem>>, vector<1x4x256xf32>,
    return
  }
  func.func @transform_0(%arg0: i32, %arg1: i32) -> (i32, i32, i32) {
    %c0_i32 = arith.constant 0 : i32
    %c0_i32_0 = arith.constant 0 : i32
    return %arg0, %arg1, %c0_i32 : i32, i32, i32
  }
  func.func @transform_1(%arg0: i32, %arg1: i32) -> (i32, i32, i32) {
    %c0_i32 = arith.constant 0 : i32
    %c0_i32_0 = arith.constant 0 : i32
    %c0_i32_1 = arith.constant 0 : i32
    return %arg0, %c0_i32, %c0_i32_0 : i32, i32, i32
  }
  func.func @transform_2(%arg0: i32, %arg1: i32) -> (i32, i32, i32) {
    %c0_i32 = arith.constant 0 : i32
    %c0_i32_0 = arith.constant 0 : i32
    return %arg0, %arg1, %c0_i32 : i32, i32, i32
  }
  func.func @transform_3(%arg0: i32, %arg1: i32) -> (i32, i32, i32) {
    %c0_i32 = arith.constant 0 : i32
    %c0_i32_0 = arith.constant 0 : i32
    return %arg0, %arg1, %c0_i32 : i32, i32, i32
  }
  func.func @transform_4(%arg0: i32, %arg1: i32) -> (i32, i32, i32) {
    %c0_i32 = arith.constant 0 : i32
    %c0_i32_0 = arith.constant 0 : i32
    return %arg0, %arg1, %c0_i32 : i32, i32, i32
  }
}

</mosaic_0001>

<bundles_post_ra>
// kernel: tpu_custom_call.1
= control target key start
LH: loop header
LB: loop body
LE: loop exit
PB: predicated region body
PF: predicated region fallthrough
CT: control target
= control target key end

     0   :  { %9 = vsyncpa [#allocation3], 0  ;;  %s894_s0 = inlined_call_operand.vmem [shape: f32[2,4,256], index: 0, kind: input, shape index: {}]   ;;  %s895_s1 = inlined_call_operand.vmem [shape: f32[2,1,256], index: 1, kind: input, shape index: {}]   ;;  %s896_s2 = inlined_call_operand.vmem [shape: f32[2,4,1], index: 2, kind: input, shape index: {}]   ;;  %s897_s3 = inlined_call_operand.vmem [shape: f32[2,4,1], index: 3, kind: input, shape index: {}]   ;;  %s898_s4 = inlined_call_operand.hbm [shape: f32[2,4,256], index: 4, kind: output, shape index: {}]  }
   0x1   :  { %11 = vsyncpa [#allocation3 + $0x1], 0  ;;  %s744_s15 = smov 0   ;;  %s746_s16 = smov 0  }
   0x2   :  { %s748_s17 = smov 0   ;;  %s750_s18 = smov 0  }
   0x3   :  { %s752_s19 = smov 0   ;;  %s754_s20 = smov 0  }
   0x4 LB: > { %s555_s21 = sadd.s32 4294967295, %s714_s20   ;;  %s556_s22 = sadd.s32 4294967294, %s714_s20   ;;  %s714_s20 = sphi %s754_s20, %s17_s20   ;;  %s710_s19 = sphi %s752_s19, %s905_s19   ;;  %s706_s18 = sphi %s750_s18, %s904_s18   ;;  %s702_s17 = sphi %s748_s17, %s903_s17   ;;  %s698_s16 = sphi %s746_s16, %s902_s16   ;;  %s694_s15 = sphi %s744_s15, %s901_s15  }
   0x5   : > { %s29_s23 = sadd.s32 1, %s710_s19  ;;  %s148_s24 = sadd.s32 1, %s702_s17 }
   0x6   : > { %p31_p0 = scmp.ge.s32.totalorder %s29_s23, 2  ;;  %p158_p1 = scmp.ne.s32.totalorder %s702_s17, %s698_s16 }
   0x7   : > { %p159_p2 = scmp.eq.s32.totalorder %s555_s21, 1  ;;  %p164_p3 = scmp.ne.s32.totalorder %s698_s16, %s694_s15 }
   0x8   : > { %s907_s23 = smov (%p31_p0, %s29_s23), 0  ;;  %p165_p5 = scmp.eq.s32.totalorder %s556_s22, 1 }
   0x9   : > { %p784_p4 = por %p159_p2, %p158_p1  ;;  %s143_s26 = ssub.s32 %s710_s19, %s907_s23 }
   0xa   : > { %p559_p6 = scmp.ge.s32.totalorder %s714_s20, 1  ;;  %p146_p7 = scmp.eq.s32.totalorder %s143_s26, 0 }
   0xb   : > { %p791_p8 = por %p165_p5, %p164_p3  ;;  %p222_p9 = scmp.lt.s32.totalorder %s714_s20, 3 }
   0xc   : > { %s797_s28 = scalar_select %p146_p7, %s702_s17, %s148_s24  }
   0xd   : > { %p223_p10 = pnand %p559_p6, %p222_p9 }
   0xe   : > { %p270_p11 = scmp.lt.s32.totalorder (!%p223_p10), %s706_s18, 1  ;;  %v300_v0 = vlaneseq (!%p223_p10)  ;;  %vm331_vm0 = vcmask (!%p223_p10), 1040384   ;;  %vm314_vm1 = vcmask (!%p223_p10), 1043456   ;;  %v716_v33 = vmov (!%p223_p10), 0  }
   0xf   : > { %226 = sbr.rel (%p223_p10) target bundleno = 368 (0x170), region = 36  ;;  %630 = vset.pattern.permute.xlu1 (!%p223_p10), %v716_v33  ;;  %631 = vset.pattern.permute.xlu0 (!%p223_p10), %v716_v33  ;;  %v717_v58 = vmov (!%p223_p10), 839922192  }
  0x10   : > { %v803_v1 = vshrl.u32 (!%p223_p10), %v300_v0, 7  ;;  %v394_v59 = vunpack.c.l.s4 (!%p223_p10), %v717_v58 }
  0x12   : > { %v302_v2 = vsub.s32 (!%p223_p10), 0, %v803_v1  ;;  %v306_v3 = vsub.s32 (!%p223_p10), 1, %v803_v1  ;;  %v395_v60 = vunpack.c.0.s8 (!%p223_p10), %v394_v59 }
  0x14   : > { %v398_v61 = vsub.s32 (!%p223_p10), %v395_v60, %v803_v1 }
  0x16   : > { %s801_s29 = scalar_select %p270_p11, %s706_s18, 1 }
  0x18   : > { %s563_s30 = sshll.u32 %s801_s29, 1  ;;  %s571_s5 = sshll.u32 %s801_s29, 3 }
  0x19   : > { %s282_s8 = scalar_lea.vmem %s895_s1, %s563_s30  ;;  %s278_s11 = scalar_lea.vmem %s894_s0, %s571_s5 }
  0x1a   : > { %v298_v4 = vld [vmem:[%s282_s8] sm:$0x3]  ;;  %s564_s12 = sshll.u32 %s801_s29, 2  ;;  %s267_s29 = sand.u32 1, %s698_s16  }
  0x1b   : > { %v303_v5 = vrot.slane %v298_v4, %v302_v2  ;;  %v307_v6 = vrot.slane %v298_v4, %v306_v3  ;;  %v815_v7 = vld [vmem:[%s278_s11] sm:$0xff]  ;;  %v346_v8 = vmul.f32 %v298_v4, %v298_v4  ;;  %s289_s21 = scalar_lea.vmem %s896_s2, %s564_s12  ;;  %s296_s26 = scalar_lea.vmem %s897_s3, %s564_s12 }
  0x1c   : > { %v382_v52 = vld [vmem:[%s289_s21] sm:$0xf]  ;;  %s560_s30 = sshll.u32 %s267_s29, 3  ;;  %s572_s5 = sshll.u32 %s706_s18, 7 }
  0x1d   : > { %v332_v9 = vsel %vm331_vm0, %v303_v5, 0.0  ;;  %v333_v10 = vsel %vm331_vm0, %v307_v6, 0.0  ;;  %v819_v11 = vcombine.low %v303_v5, %v307_v6  ;;  %v351_v14 = vrot.slane %v346_v8, %v302_v2  ;;  %v386_v55 = vld [vmem:[%s296_s26] sm:$0xf]  ;;  %s269_s6 = scalar_lea.vmem [#allocation2], %s560_s30  ;;  %s847_s10 = scalar_lea.hbm %s898_s4, %s572_s5 }
  0x1e   : > { %v334_v12 = vadd.f32 %v333_v10, %v332_v9  ;;  %v355_v18 = vrot.slane %v346_v8, %v306_v3  ;;  %s434_s7 = sshll.u32 %s269_s6, 4  ;;  %s418_s11 = scalar_lea.sflag [#allocation3], %s267_s29  ;;  %s849_s7 = int_to_ptr.vmem [resolvable:$true] %s434_s7 }
  0x1f   : > { %v310_v13 = vmul.f32 %v819_v11, %v815_v7  ;;  %v358_v27 = vsel %vm331_vm0, %v351_v14, 0.0  ;;  %s636_s12 = scalar_lea.vmem %s849_s7, 128  ;;  %s718_s18 = smov [#allocation2]  }
  0x20   : > { %335 = vadd.xlane.f32.xlu0 %v334_v12  ;;  %v359_v28 = vsel %vm331_vm0, %v355_v18, 0.0  ;;  %p637_p12 = scmp.ne.s32.totalorder %s849_s7, %s636_s12  ;;  %s640_s13 = sshll.u32 %s718_s18, 4  ;;  %s641_s13 = int_to_ptr.vmem [resolvable:$false] %s640_s13 }
  0x21   : > { %v337_v15 = vmul.f32 %v310_v13, %v819_v11  ;;  %v312_v16 = vcombine.high %v310_v13, %v310_v13  ;;  %v315_v17 = vsel %vm314_vm1, %v310_v13, 0.0  ;;  %v320_v19 = vmul.f32 %v310_v13, %v310_v13  ;;  %s642_s14 = scalar_lea.vmem %s641_s13, 256  ;;  %p643_p1 = scmp.lt.s32.totalorder %s849_s7, %s641_s13 }
  0x22   : > { %v360_v32 = vadd.f32 %v359_v28, %v358_v27  ;;  %p638_p13 = pnand %p637_p12, %p784_p4  ;;  %p644_p2 = scmp.lt.s32.totalorder %s642_s14, %s636_s12 }
  0x23   : > { %v339_v20 = vcombine.high %v337_v15, %v337_v15  ;;  %v341_v21 = vsel %vm314_vm1, %v337_v15, 0.0  ;;  %v316_v22 = vsel %vm314_vm1, %v312_v16, 0.0  ;;  %v322_v24 = vcombine.high %v320_v19, %v320_v19 }
  0x24   : > { %v317_v23 = vadd.f32 %v316_v22, %v315_v17  ;;  %v324_v25 = vsel %vm314_vm1, %v320_v19, 0.0  ;;  %p639_p0 = pneg %p638_p13  ;;  %p645_p3 = por %p644_p2, %p643_p1 }
  0x25   : > { %v342_v26 = vsel %vm314_vm1, %v339_v20, 0.0  ;;  %v325_v30 = vsel %vm314_vm1, %v322_v24, 0.0 }
  0x26   : > { %v343_v29 = vadd.f32 %v342_v26, %v341_v21  ;;  %318 = vadd.xlane.f32.xlu0 %v317_v23  ;;  %v326_v31 = vadd.f32 %v325_v30, %v324_v25  ;;  %p646_p5 = pnand %p645_p3, %p639_p0 }
  0x28   : > { %344 = vadd.xlane.f32.xlu1 %v343_v29 }
  0x2a   : > { %327 = vadd.xlane.f32.xlu0 %v326_v31 }
  0x2c   : > { %361 = vadd.xlane.f32.xlu1 %v360_v32 }
  0xad   : > { %v336_v34 = vpop.xlane.xlu0 %335 }
  0xae   : > { %632 = vrcp.f32 %v336_v34 }
  0xb3   : > { %v319_v37 = vpop.xlane.xlu0 %318 }
  0xb5   : > { %v345_v35 = vpop.xlane.xlu1 %344 }
  0xb7   : > { %v328_v44 = vpop.xlane.xlu0 %327 }
  0xb8   : > { %v633_v36 = vpop.eup %632 }
  0xb9   : > { %v368_v38 = vrot.slane %v633_v36, %v302_v2  ;;  %v362_v39 = vpop.xlane.xlu1 %361 }
  0xba   : > { %v377_v42 = vrot.slane %v362_v39, %v302_v2 }
  0xbb   : > { %v369_v40 = vmul.f32 %v368_v38, %v319_v37 }
  0xbd   : > { %v373_v41 = vmul.f32 %v369_v40, %v369_v40  ;;  %v370_v43 = vmul.f32 2.0, %v369_v40 }
  0xbf   : > { %v371_v45 = vmul.f32 %v370_v43, %v345_v35  ;;  %v378_v46 = vmul.f32 %v377_v42, %v373_v41 }
  0xc1   : > { %v372_v47 = vsub.f32 %v328_v44, %v371_v45 }
  0xc3   : > { %v379_v48 = vadd.f32 %v378_v46, %v372_v47 }
  0xc5   : > { %v380_v49 = vmul.f32 %v379_v48, %v368_v38 }
  0xc7   : > { %v381_v50 = vmax.f32 %v380_v49, 0.0 }
  0xc9   : > { %v383_v51 = vadd.f32 1e-08, %v381_v50 }
  0xcb   : > { %634 = vrsqrt.f32 %v383_v51 }
  0xd5   : > { %v635_v53 = vpop.eup %634 }
  0xd6   : > { %v385_v54 = vmul.f32 %v635_v53, %v382_v52 }
  0xd8   : > { %391 = vperm.xlu1 %630, %v385_v54   ;;  %v387_v56 = vmul.f32 %v385_v54, %v369_v40 }
  0xda   : > { %v388_v57 = vsub.f32 %v386_v55, %v387_v56 }
  0xdc   : > { %404 = vperm.xlu0 %631, %v388_v57  }
 0x157   : > { %v392_v62 = vpop.permute.xlu1 %391 }
 0x158   : > { %v399_v63 = vrot.slane %v392_v62, %v398_v61 }
 0x15a   : > { %v401_v2 = vmul.f32 %v399_v63, %v815_v7 }
 0x15b   : > { %v405_v0 = vpop.permute.xlu0 %404 }
 0x15c   : > { %v412_v3 = vrot.slane %v405_v0, %v398_v61 }
 0x15e   : > { %v414_v4 = vadd.f32 %v412_v3, %v401_v2 }
 0x160   : > { %v415_v5 = vmul.f32 %v414_v4, %v819_v11 }
 0x162   : > { %416 = vst [vmem:[%s269_s6] sm:$0xff] %v415_v5 }
 0x163   : > { %649 = shalt.err (!%p646_p5)
}
 0x164   : > { %s650_s21 = scalar_lea.hbm %s847_s10, 128  ;;  %s654_s26 = scalar_lea.hbm %s898_s4, 256 }
 0x165   : > { %p651_p6 = scmp.ne.s32.totalorder %s847_s10, %s650_s21  ;;  %p655_p10 = scmp.lt.u32.totalorder %s847_s10, %s898_s4 }
 0x166   : > { %p656_p11 = scmp.lt.u32.totalorder %s654_s26, %s650_s21  ;;  %p658_p13 = scmp.lt.u32.totalorder %s650_s21, %s847_s10 }
 0x167   : > { %p652_p7 = pnand %p651_p6, %p784_p4 }
 0x168   : > { %p657_p12 = por %p656_p11, %p655_p10 }
 0x169   : > { %p653_p9 = pneg %p652_p7 }
 0x16a   : > { %p659_p0 = por %p658_p13, %p657_p12 }
 0x16c   : > { %p660_p1 = pnand %p659_p0, %p653_p9 }
 0x16e   : > { %663 = shalt.err (!%p660_p1)
}
 0x16f   : > { %573 = dma.vmem_to_hbm [thread:$0]  (%p784_p4), %s849_s7, 128, %s847_s10, %s418_s11  }
 0x170 PF: > { %p579_p2 = scmp.ge.s32.totalorder %s714_s20, 2  ;;  %s446_s5 = sand.u32 1, %s694_s15  }
 0x171   : > { %s447_s6 = scalar_lea.sflag [#allocation3], %s446_s5 }
 0x172   : > { %p576_p3 = pnand %p579_p2, %p791_p8 }
 0x174   : > { %689 = dma.done.wait (!%p576_p3), %s447_s6, 128  }
 0x175   : > { %691 = vsyncadd (!%p576_p3), %s447_s6, 4294967168  ;;  %s17_s20 = sadd.s32 1, %s714_s20   ;;  %s901_s15 = smov %s698_s16 }
 0x176   : > { %p14_p5 = scmp.ge.s32.totalorder %s17_s20, 4   ;;  %s902_s16 = smov %s702_s17 }
 0x177   : > { %s903_s17 = smov %s797_s28  ;;  %s904_s18 = smov %s710_s19 }
 0x178   : > { %s905_s19 = smov %s907_s23  ;;  %16 = sbr.rel (!%p14_p5) target bundleno = 4 (0x4), region = 80 }
 0x17f   :  { %452 = vsyncpa [#allocation3], 1 }
 0x180   :  { %454 = vsyncpa [#allocation3 + $0x1], 1 }

</bundles_post_ra>
